<compile_context>
chip_gen: v5e
topology: v5e:2x2
jax: 0.10.0
libtpu: 0.0.40
codegen_flags: <defaults>
</compile_context>

<pallas_src>
from functools import partial

import jax
import jax.numpy as jnp
from jax import lax
from jax.experimental import pallas as pl
from jax.experimental.pallas import tpu as pltpu


def _basic_block_kernel(x_ref, w1_ref, s1_ref, b1_ref, w2_ref, s2_ref, b2_ref,
                        meca_ref, out_ref, *, img_rows):
    """One grid step = NB images, flattened to lane-dense rows.

    x_ref   : (NB*H, W*C)  bf16  lane-dense input rows (also the residual)
    w1_ref  : (3, WC, WC)  bf16  conv1 block-banded weights, one (WC,WC) per ky
    s1_ref  : (1, WC)      f32   folded BN1 scale, tiled over W (lane-dense)
    b1_ref  : (1, WC)      f32   folded BN1 bias
    w2_ref  : (3, WC, WC)  bf16  conv2 block-banded weights
    s2_ref  : (1, WC)      f32   folded BN2 scale
    b2_ref  : (1, WC)      f32   folded BN2 bias
    meca_ref: (WC, WC)     f32   fused ECA matrix (W-mean * k=3 taps * tile-back)
    out_ref : (NB*H, W*C)  bf16  lane-dense output rows
    """
    R, WC = x_ref.shape
    H = img_rows
    NB = R // H

    x_bf = x_ref[...]                                     # (R, WC) bf16; residual too

    # Row-shift validity masks, built in-kernel (no extra operands): a row at an
    # image's top/bottom sees a zero halo instead of the neighbouring image's row.
    h_idx = lax.broadcasted_iota(jnp.int32, (R, WC), 0) % H
    up_ok = h_idx > 0                                     # row h-1 exists
    dn_ok = h_idx < H - 1                                 # row h+1 exists
    zrow = jnp.zeros((1, WC), x_bf.dtype)

    def conv3x3(src_bf, w_ref):
        # 3x3 "same" conv as 3 lane-dense bf16 MXU matmuls (one per ky) against
        # (WC, WC) block-banded weights; the W boundary is encoded in the band,
        # the H boundary in the masks above.  f32 accumulation; every operand
        # keeps the full 128-lane width (no (HW,C) relayouts).
        up = jnp.where(up_ok, jnp.concatenate([zrow, src_bf[:R - 1]], axis=0), 0)
        dn = jnp.where(dn_ok, jnp.concatenate([src_bf[1:], zrow], axis=0), 0)
        acc = jnp.dot(up, w_ref[0], preferred_element_type=jnp.float32)
        acc = acc + jnp.dot(src_bf, w_ref[1], preferred_element_type=jnp.float32)
        acc = acc + jnp.dot(dn, w_ref[2], preferred_element_type=jnp.float32)
        return acc                                        # (R, WC) f32

    # conv1 -> folded BN1 -> ReLU (lane-dense; bf16 for the second MXU pass)
    o1 = conv3x3(x_bf, w1_ref)
    o1 = jnp.maximum(o1 * s1_ref[...] + b1_ref[...], 0.0).astype(jnp.bfloat16)

    # conv2 -> folded BN2 (f32, lane-dense)
    o2 = conv3x3(o1, w2_ref) * s2_ref[...] + b2_ref[...]  # (R, WC) f32

    # Per-image epilogue: ECA gate (H-mean -> one (WC,WC) matmul that folds the
    # W-mean, the k=3 channel taps and the tile-back) -> gate * o2 + identity ->
    # ReLU -> bf16 store.  NB is a small static count, so the loop unrolls.
    for n in range(NB):
        o2_n = o2[n * H:(n + 1) * H]                                    # (H, WC) f32
        pooled = jnp.mean(o2_n, axis=0, keepdims=True)                  # (1, WC)
        gate = jax.nn.sigmoid(jnp.dot(pooled, meca_ref[...],
                                      preferred_element_type=jnp.float32))
        x_n = x_bf[n * H:(n + 1) * H].astype(jnp.float32)               # residual
        out_ref[pl.ds(n * H, H), :] = jnp.maximum(
            o2_n * gate + x_n, 0.0).astype(out_ref.dtype)


def basic_block_lane(x_lane, params, C, *, batch_tile=None):
    """Fused BasicBlock on the lane-dense layout.

    x_lane: (N, H, W*C), any float dtype (cast to bf16 for transfer).
    Returns (N, H, W*C) bf16.  Stack blocks by calling this directly (no NCHW
    transposes between blocks).
    """
    N, H, WC = x_lane.shape
    W = WC // C
    if W * C != WC:
        raise ValueError("W*C mismatch")
    # Lane-dense layout contract: full-lane rows and 8-sublane-aligned image height.
    if WC % 128 != 0 or H % 8 != 0:
        raise ValueError("basic_block_lane requires W*C % 128 == 0 and H % 8 == 0")
    if batch_tile is None:
        # Grid length >= 2 keeps both v7x TensorCores busy ("parallel" axis) while
        # each step still carries a non-trivial (NB*H, WC) slab.
        batch_tile = N // 2 if (N % 2 == 0 and N > 1) else N
    NB = batch_tile
    if N % NB != 0:
        raise ValueError("batch_tile must divide N")
    eps = 1e-5

    # ---- fold BN into scale/bias, tiled lane-dense over W ----
    def fold(g, b, m, v):
        s = (g / jnp.sqrt(v + eps)).astype(jnp.float32)
        return s, (b - m * s).astype(jnp.float32)

    s1, b1 = fold(params["bn1_gamma"], params["bn1_beta"],
                  params["bn1_mean"], params["bn1_var"])
    s2, b2 = fold(params["bn2_gamma"], params["bn2_beta"],
                  params["bn2_mean"], params["bn2_var"])
    tile_wc = lambda v: jnp.tile(v.reshape(1, C), (1, W))
    s1_wc, b1_wc, s2_wc, b2_wc = map(tile_wc, (s1, b1, s2, b2))

    # ---- block-banded conv weights: one (WC, WC) matrix per ky ----
    # M_ky[w'*C + ci, w*C + co] = W_oihw[co, ci, ky, kx] when w' == w + kx - 1.
    def banded(w_oihw):
        wt = jnp.transpose(w_oihw, (2, 3, 1, 0)).astype(jnp.float32)    # (ky,kx,ci,co)
        p = jnp.arange(W)[:, None, None]
        q = jnp.arange(W)[None, :, None]
        k = jnp.arange(3)[None, None, :]
        band = (p == q + k - 1).astype(jnp.float32)                     # (W, W, 3)
        m = jnp.einsum('pqk,ykio->ypiqo', band, wt)                     # (3,W,C,W,C)
        return m.reshape(3, WC, WC).astype(jnp.bfloat16)

    w1b = banded(params["conv1_w"])
    w2b = banded(params["conv2_w"])

    # ---- fused ECA matrix: (1/W W-mean) x (k=3 channel taps) x tile-back ----
    taps = params["eca_w"].astype(jnp.float32)
    ci = jnp.arange(C)[:, None]
    co = jnp.arange(C)[None, :]
    d = ci - co
    tap_cc = jnp.where(jnp.abs(d) <= 1, taps[jnp.clip(d + 1, 0, 2)], 0.0) / W
    m_eca = jnp.tile(tap_cc, (W, W))                                    # (WC, WC) f32

    R = NB * H
    x_rows = x_lane.reshape(N * H, WC).astype(jnp.bfloat16)

    kernel = partial(_basic_block_kernel, img_rows=H)

    # Advisory cost estimate so XLA schedules the surrounding layout ops around us.
    flops = 2 * (2 * N * H * W * 9 * C * C)            # two 3x3 convs (MAC = 2 flops)
    bytes_accessed = (N * H * WC * 2                   # bf16 input
                      + N * H * WC * 2                 # bf16 output
                      + 2 * 3 * WC * WC * 2            # banded conv weights (bf16)
                      + WC * WC * 4 + 4 * WC * 4)      # ECA matrix + BN params (f32)
    cost = pl.CostEstimate(flops=flops, transcendentals=N * C,
                           bytes_accessed=bytes_accessed)

    const2 = lambda shape: pl.BlockSpec(shape, lambda g: (0, 0))
    const3 = lambda shape: pl.BlockSpec(shape, lambda g: (0, 0, 0))

    out_rows = pl.pallas_call(
        kernel,
        out_shape=jax.ShapeDtypeStruct((N * H, WC), jnp.bfloat16),
        grid=(N // NB,),
        in_specs=[
            pl.BlockSpec((R, WC), lambda g: (g, 0)),   # x (bf16, lane-dense rows)
            const3((3, WC, WC)),                       # banded conv1 weights
            const2((1, WC)), const2((1, WC)),          # folded BN1 scale / bias
            const3((3, WC, WC)),                       # banded conv2 weights
            const2((1, WC)), const2((1, WC)),          # folded BN2 scale / bias
            const2((WC, WC)),                          # fused ECA matrix
        ],
        out_specs=pl.BlockSpec((R, WC), lambda g: (g, 0)),
        compiler_params=pltpu.CompilerParams(
            dimension_semantics=("parallel",),         # shard batch tiles across TCs
            vmem_limit_bytes=8 * 1024 * 1024,          # working set ~1 MiB here
        ),
        cost_estimate=cost,
    )(x_rows, w1b, s1_wc, b1_wc, w2b, s2_wc, b2_wc, m_eca)
    return out_rows.reshape(N, H, WC)


def basic_block_pallas(x_nchw, params):
    """PyTorch-facing wrapper: NCHW f32 in -> NCHW f32 out (single layout round trip;
    the kernel itself reads/writes bf16)."""
    N, C, H, W = x_nchw.shape
    x_lane = jnp.transpose(x_nchw, (0, 2, 3, 1)).reshape(N, H, W * C)
    out_lane = basic_block_lane(x_lane, params, C)
    out = out_lane.reshape(N, H, W, C).astype(jnp.float32)
    return jnp.transpose(out, (0, 3, 1, 2))


# ----------------------------- pure-JAX reference -----------------------------
def basic_block_reference(x_nchw, params):
    """Same numerics as the kernel (up to the final bf16 store): bf16 activations /
    weights into the convs, f32 accumulation, f32 epilogue (inference-mode BN,
    ECA k=3, identity residual)."""
    N, C, H, W = x_nchw.shape
    eps = 1e-5
    x = jnp.transpose(x_nchw, (0, 2, 3, 1)).astype(jnp.bfloat16)   # NHWC, bf16

    def conv3x3(inp_bf16, w_oihw):
        w = jnp.transpose(w_oihw, (2, 3, 1, 0)).astype(jnp.bfloat16)  # HWIO
        return lax.conv_general_dilated(
            inp_bf16, w, window_strides=(1, 1), padding=((1, 1), (1, 1)),
            dimension_numbers=("NHWC", "HWIO", "NHWC"),
            preferred_element_type=jnp.float32)

    def bn(o, g, b, m, v):
        s = g / jnp.sqrt(v + eps)
        return o * s + (b - m * s)

    out = conv3x3(x, params["conv1_w"])
    out = jnp.maximum(bn(out, params["bn1_gamma"], params["bn1_beta"],
                         params["bn1_mean"], params["bn1_var"]), 0.0)
    out = conv3x3(out.astype(jnp.bfloat16), params["conv2_w"])
    out = bn(out, params["bn2_gamma"], params["bn2_beta"],
             params["bn2_mean"], params["bn2_var"])

    # ECA
    pooled = jnp.mean(out, axis=(1, 2))                     # (N, C)
    pp = jnp.pad(pooled, ((0, 0), (1, 1)))
    w = params["eca_w"]
    y = w[0] * pp[:, :C] + w[1] * pp[:, 1:C + 1] + w[2] * pp[:, 2:C + 2]
    gate = jax.nn.sigmoid(y)
    out = out * gate[:, None, None, :]

    out = jnp.maximum(out + x.astype(jnp.float32), 0.0)
    return jnp.transpose(out, (0, 3, 1, 2))


def make_params(key, C):
    ks = jax.random.split(key, 11)
    return {
        "conv1_w": jax.random.normal(ks[0], (C, C, 3, 3), jnp.float32) * 0.1,
        "conv2_w": jax.random.normal(ks[1], (C, C, 3, 3), jnp.float32) * 0.1,
        "bn1_gamma": jax.random.uniform(ks[2], (C,), jnp.float32, 0.5, 1.5),
        "bn1_beta": jax.random.normal(ks[3], (C,), jnp.float32) * 0.1,
        "bn1_mean": jax.random.normal(ks[4], (C,), jnp.float32) * 0.1,
        "bn1_var": jax.random.uniform(ks[5], (C,), jnp.float32, 0.5, 1.5),
        "bn2_gamma": jax.random.uniform(ks[6], (C,), jnp.float32, 0.5, 1.5),
        "bn2_beta": jax.random.normal(ks[7], (C,), jnp.float32) * 0.1,
        "bn2_mean": jax.random.normal(ks[8], (C,), jnp.float32) * 0.1,
        "bn2_var": jax.random.uniform(ks[9], (C,), jnp.float32, 0.5, 1.5),
        "eca_w": jax.random.normal(ks[10], (3,), jnp.float32) * 0.5,
    }


if __name__ == "__main__":
    # Stand-in for BasicBlock(inplanes=8, planes=8, stride=1, downsample=None, k_size=3).
    # C=8, W=16 makes W*C == 128 (one full lane width per image row); N=4 gives a
    # grid of 2 steps x 2 images per step.
    N, C, H, W = 4, 8, 16, 16
    key = jax.random.PRNGKey(0)
    kx, kp = jax.random.split(key)
    x = jax.random.normal(kx, (N, C, H, W), jnp.float32)
    params = make_params(kp, C)

    out = jax.block_until_ready(basic_block_pallas(x, params))
    ref = jax.block_until_ready(basic_block_reference(x, params))

    assert out.shape == (N, C, H, W)
    # Kernel stores bf16 (per perf review); tolerance covers the final bf16 rounding.
    if not jnp.allclose(out, ref, rtol=1e-2, atol=1e-2):
        max_err = float(jnp.max(jnp.abs(out - ref)))
        raise AssertionError(f"mismatch vs reference, max abs err = {max_err}")
    print("KERNEL_OK")
</pallas_src>

<mosaic_0001>
module attributes {stable_mosaic.version = 11 : i64} {
  func.func @_basic_block_kernel(%arg0: i32, %arg1: memref<32x128xbf16, #tpu.memory_space<vmem>>, %arg2: memref<3x128x128xbf16, #tpu.memory_space<vmem>>, %arg3: memref<1x128xf32, #tpu.memory_space<vmem>>, %arg4: memref<1x128xf32, #tpu.memory_space<vmem>>, %arg5: memref<3x128x128xbf16, #tpu.memory_space<vmem>>, %arg6: memref<1x128xf32, #tpu.memory_space<vmem>>, %arg7: memref<1x128xf32, #tpu.memory_space<vmem>>, %arg8: memref<128x128xf32, #tpu.memory_space<vmem>>, %arg9: memref<32x128xbf16, #tpu.memory_space<vmem>>) attributes {dimension_semantics = [#tpu.dimension_semantics<parallel>], iteration_bounds = array<i64: 2>, scalar_prefetch = 0 : i64, scratch_operands = 0 : i64, tpu.core_type = #tpu.core_type<tc>, window_params = [{transform_indices = @transform_0, window_bounds = array<i64: 32, 128>}, {pipeline_mode = #tpu.pipeline_mode<synchronous>, transform_indices = @transform_1, window_bounds = array<i64: 3, 128, 128>}, {pipeline_mode = #tpu.pipeline_mode<synchronous>, transform_indices = @transform_2, window_bounds = array<i64: 1, 128>}, {pipeline_mode = #tpu.pipeline_mode<synchronous>, transform_indices = @transform_3, window_bounds = array<i64: 1, 128>}, {pipeline_mode = #tpu.pipeline_mode<synchronous>, transform_indices = @transform_4, window_bounds = array<i64: 3, 128, 128>}, {pipeline_mode = #tpu.pipeline_mode<synchronous>, transform_indices = @transform_5, window_bounds = array<i64: 1, 128>}, {pipeline_mode = #tpu.pipeline_mode<synchronous>, transform_indices = @transform_6, window_bounds = array<i64: 1, 128>}, {pipeline_mode = #tpu.pipeline_mode<synchronous>, transform_indices = @transform_7, window_bounds = array<i64: 128, 128>}, {transform_indices = @transform_8, window_bounds = array<i64: 32, 128>}]} {
    %c0 = arith.constant 0 : index
    %c0_0 = arith.constant 0 : index
    %0 = vector.load %arg1[%c0, %c0_0] : memref<32x128xbf16, #tpu.memory_space<vmem>>, vector<32x128xbf16>
    %1 = tpu.iota {dimensions = array<i32: 0>} : vector<32x128xi32>
    %c16_i32 = arith.constant 16 : i32
    %c0_i32 = arith.constant 0 : i32
    %2 = arith.cmpi eq, %c16_i32, %c0_i32 : i32
    %c1_i32 = arith.constant 1 : i32
    %3 = arith.select %2, %c1_i32, %c16_i32 : i32
    %4 = vector.broadcast %3 : i32 to vector<32x128xi32>
    %5 = arith.remsi %1, %4 : vector<32x128xi32>
    %c0_i32_1 = arith.constant 0 : i32
    %6 = vector.broadcast %c0_i32_1 : i32 to vector<32x128xi32>
    %7 = arith.cmpi ne, %5, %6 : vector<32x128xi32>
    %c0_i32_2 = arith.constant 0 : i32
    %8 = vector.broadcast %c0_i32_2 : i32 to vector<32x128xi32>
    %9 = arith.cmpi slt, %5, %8 : vector<32x128xi32>
    %c0_i32_3 = arith.constant 0 : i32
    %10 = arith.cmpi slt, %3, %c0_i32_3 : i32
    %11 = vector.broadcast %10 : i1 to vector<32x128xi1>
    %12 = vector.broadcast %11 : vector<32x128xi1> to vector<32x128xi1>
    %13 = arith.xori %9, %12 : vector<32x128xi1>
    %14 = arith.andi %13, %7 : vector<32x128xi1>
    %15 = vector.broadcast %3 : i32 to vector<32x128xi32>
    %16 = arith.addi %5, %15 : vector<32x128xi32>
    %17 = arith.select %14, %16, %5 : vector<32x128xi1>, vector<32x128xi32>
    %c0_i32_4 = arith.constant 0 : i32
    %18 = vector.broadcast %c0_i32_4 : i32 to vector<32x128xi32>
    %19 = arith.cmpi sgt, %17, %18 : vector<32x128xi32>
    %c15_i32 = arith.constant 15 : i32
    %20 = vector.broadcast %c15_i32 : i32 to vector<32x128xi32>
    %21 = arith.cmpi slt, %17, %20 : vector<32x128xi32>
    %cst = arith.constant 0.000000e+00 : bf16
    %22 = vector.broadcast %cst : bf16 to vector<1x128xbf16>
    %23 = vector.extract_strided_slice %0 {offsets = [0, 0], sizes = [31, 128], strides = [1, 1]} : vector<32x128xbf16> to vector<31x128xbf16>
    %24 = tpu.concatenate %22, %23 in 0 : vector<1x128xbf16>, vector<31x128xbf16> -> vector<32x128xbf16>
    %c0_i32_5 = arith.constant 0 : i32
    %25 = arith.sitofp %c0_i32_5 : i32 to bf16
    %26 = vector.broadcast %25 : bf16 to vector<32x128xbf16>
    %27 = arith.select %19, %24, %26 : vector<32x128xi1>, vector<32x128xbf16>
    %28 = vector.extract_strided_slice %0 {offsets = [1, 0], sizes = [31, 128], strides = [1, 1]} : vector<32x128xbf16> to vector<31x128xbf16>
    %29 = tpu.concatenate %28, %22 in 0 : vector<31x128xbf16>, vector<1x128xbf16> -> vector<32x128xbf16>
    %c0_i32_6 = arith.constant 0 : i32
    %30 = arith.sitofp %c0_i32_6 : i32 to bf16
    %31 = vector.broadcast %30 : bf16 to vector<32x128xbf16>
    %32 = arith.select %21, %29, %31 : vector<32x128xi1>, vector<32x128xbf16>
    %c0_7 = arith.constant 0 : index
    %c0_8 = arith.constant 0 : index
    %c0_9 = arith.constant 0 : index
    %33 = vector.load %arg2[%c0_7, %c0_8, %c0_9] : memref<3x128x128xbf16, #tpu.memory_space<vmem>>, vector<1x128x128xbf16>
    %34 = vector.shape_cast %33 : vector<1x128x128xbf16> to vector<128x128xbf16>
    %cst_10 = arith.constant dense<0.000000e+00> : vector<32x128xf32>
    %35 = tpu.matmul %27, %34, %cst_10 {dimension_numbers = #tpu.dot_dimension_numbers<[1], [0], [0], [1], [0, 0, 1, 1], [], []>} : vector<32x128xbf16>, vector<128x128xbf16>, vector<32x128xf32> -> vector<32x128xf32>
    %c1 = arith.constant 1 : index
    %c0_11 = arith.constant 0 : index
    %c0_12 = arith.constant 0 : index
    %36 = vector.load %arg2[%c1, %c0_11, %c0_12] : memref<3x128x128xbf16, #tpu.memory_space<vmem>>, vector<1x128x128xbf16>
    %37 = vector.shape_cast %36 : vector<1x128x128xbf16> to vector<128x128xbf16>
    %cst_13 = arith.constant dense<0.000000e+00> : vector<32x128xf32>
    %38 = tpu.matmul %0, %37, %cst_13 {dimension_numbers = #tpu.dot_dimension_numbers<[1], [0], [0], [1], [0, 0, 1, 1], [], []>} : vector<32x128xbf16>, vector<128x128xbf16>, vector<32x128xf32> -> vector<32x128xf32>
    %39 = arith.addf %35, %38 : vector<32x128xf32>
    %c2 = arith.constant 2 : index
    %c0_14 = arith.constant 0 : index
    %c0_15 = arith.constant 0 : index
    %40 = vector.load %arg2[%c2, %c0_14, %c0_15] : memref<3x128x128xbf16, #tpu.memory_space<vmem>>, vector<1x128x128xbf16>
    %41 = vector.shape_cast %40 : vector<1x128x128xbf16> to vector<128x128xbf16>
    %cst_16 = arith.constant dense<0.000000e+00> : vector<32x128xf32>
    %42 = tpu.matmul %32, %41, %cst_16 {dimension_numbers = #tpu.dot_dimension_numbers<[1], [0], [0], [1], [0, 0, 1, 1], [], []>} : vector<32x128xbf16>, vector<128x128xbf16>, vector<32x128xf32> -> vector<32x128xf32>
    %43 = arith.addf %39, %42 : vector<32x128xf32>
    %c0_17 = arith.constant 0 : index
    %c0_18 = arith.constant 0 : index
    %44 = vector.load %arg3[%c0_17, %c0_18] : memref<1x128xf32, #tpu.memory_space<vmem>>, vector<1x128xf32>
    %45 = vector.broadcast %44 : vector<1x128xf32> to vector<32x128xf32>
    %46 = arith.mulf %43, %45 : vector<32x128xf32>
    %c0_19 = arith.constant 0 : index
    %c0_20 = arith.constant 0 : index
    %47 = vector.load %arg4[%c0_19, %c0_20] : memref<1x128xf32, #tpu.memory_space<vmem>>, vector<1x128xf32>
    %48 = vector.broadcast %47 : vector<1x128xf32> to vector<32x128xf32>
    %49 = arith.addf %46, %48 : vector<32x128xf32>
    %cst_21 = arith.constant 0.000000e+00 : f32
    %50 = vector.broadcast %cst_21 : f32 to vector<32x128xf32>
    %51 = arith.maximumf %49, %50 : vector<32x128xf32>
    %52 = arith.truncf %51 : vector<32x128xf32> to vector<32x128xbf16>
    %53 = vector.extract_strided_slice %52 {offsets = [0, 0], sizes = [31, 128], strides = [1, 1]} : vector<32x128xbf16> to vector<31x128xbf16>
    %54 = tpu.concatenate %22, %53 in 0 : vector<1x128xbf16>, vector<31x128xbf16> -> vector<32x128xbf16>
    %c0_i32_22 = arith.constant 0 : i32
    %55 = arith.sitofp %c0_i32_22 : i32 to bf16
    %56 = vector.broadcast %55 : bf16 to vector<32x128xbf16>
    %57 = arith.select %19, %54, %56 : vector<32x128xi1>, vector<32x128xbf16>
    %58 = vector.extract_strided_slice %52 {offsets = [1, 0], sizes = [31, 128], strides = [1, 1]} : vector<32x128xbf16> to vector<31x128xbf16>
    %59 = tpu.concatenate %58, %22 in 0 : vector<31x128xbf16>, vector<1x128xbf16> -> vector<32x128xbf16>
    %c0_i32_23 = arith.constant 0 : i32
    %60 = arith.sitofp %c0_i32_23 : i32 to bf16
    %61 = vector.broadcast %60 : bf16 to vector<32x128xbf16>
    %62 = arith.select %21, %59, %61 : vector<32x128xi1>, vector<32x128xbf16>
    %c0_24 = arith.constant 0 : index
    %c0_25 = arith.constant 0 : index
    %c0_26 = arith.constant 0 : index
    %63 = vector.load %arg5[%c0_24, %c0_25, %c0_26] : memref<3x128x128xbf16, #tpu.memory_space<vmem>>, vector<1x128x128xbf16>
    %64 = vector.shape_cast %63 : vector<1x128x128xbf16> to vector<128x128xbf16>
    %cst_27 = arith.constant dense<0.000000e+00> : vector<32x128xf32>
    %65 = tpu.matmul %57, %64, %cst_27 {dimension_numbers = #tpu.dot_dimension_numbers<[1], [0], [0], [1], [0, 0, 1, 1], [], []>} : vector<32x128xbf16>, vector<128x128xbf16>, vector<32x128xf32> -> vector<32x128xf32>
    %c1_28 = arith.constant 1 : index
    %c0_29 = arith.constant 0 : index
    %c0_30 = arith.constant 0 : index
    %66 = vector.load %arg5[%c1_28, %c0_29, %c0_30] : memref<3x128x128xbf16, #tpu.memory_space<vmem>>, vector<1x128x128xbf16>
    %67 = vector.shape_cast %66 : vector<1x128x128xbf16> to vector<128x128xbf16>
    %cst_31 = arith.constant dense<0.000000e+00> : vector<32x128xf32>
    %68 = tpu.matmul %52, %67, %cst_31 {dimension_numbers = #tpu.dot_dimension_numbers<[1], [0], [0], [1], [0, 0, 1, 1], [], []>} : vector<32x128xbf16>, vector<128x128xbf16>, vector<32x128xf32> -> vector<32x128xf32>
    %69 = arith.addf %65, %68 : vector<32x128xf32>
    %c2_32 = arith.constant 2 : index
    %c0_33 = arith.constant 0 : index
    %c0_34 = arith.constant 0 : index
    %70 = vector.load %arg5[%c2_32, %c0_33, %c0_34] : memref<3x128x128xbf16, #tpu.memory_space<vmem>>, vector<1x128x128xbf16>
    %71 = vector.shape_cast %70 : vector<1x128x128xbf16> to vector<128x128xbf16>
    %cst_35 = arith.constant dense<0.000000e+00> : vector<32x128xf32>
    %72 = tpu.matmul %62, %71, %cst_35 {dimension_numbers = #tpu.dot_dimension_numbers<[1], [0], [0], [1], [0, 0, 1, 1], [], []>} : vector<32x128xbf16>, vector<128x128xbf16>, vector<32x128xf32> -> vector<32x128xf32>
    %73 = arith.addf %69, %72 : vector<32x128xf32>
    %c0_36 = arith.constant 0 : index
    %c0_37 = arith.constant 0 : index
    %74 = vector.load %arg6[%c0_36, %c0_37] : memref<1x128xf32, #tpu.memory_space<vmem>>, vector<1x128xf32>
    %75 = vector.broadcast %74 : vector<1x128xf32> to vector<32x128xf32>
    %76 = arith.mulf %73, %75 : vector<32x128xf32>
    %c0_38 = arith.constant 0 : index
    %c0_39 = arith.constant 0 : index
    %77 = vector.load %arg7[%c0_38, %c0_39] : memref<1x128xf32, #tpu.memory_space<vmem>>, vector<1x128xf32>
    %78 = vector.broadcast %77 : vector<1x128xf32> to vector<32x128xf32>
    %79 = arith.addf %76, %78 : vector<32x128xf32>
    %80 = vector.extract_strided_slice %79 {offsets = [0, 0], sizes = [16, 128], strides = [1, 1]} : vector<32x128xf32> to vector<16x128xf32>
    %cst_40 = arith.constant dense<0.000000e+00> : vector<128xf32>
    %81 = vector.multi_reduction <add>, %80, %cst_40 [0] : vector<16x128xf32> to vector<128xf32>
    %82 = vector.shape_cast %81 : vector<128xf32> to vector<1x128xf32>
    %cst_41 = arith.constant 1.600000e+01 : f32
    %83 = vector.broadcast %cst_41 : f32 to vector<1x128xf32>
    %84 = arith.divf %82, %83 : vector<1x128xf32>
    %c0_42 = arith.constant 0 : index
    %c0_43 = arith.constant 0 : index
    %85 = vector.load %arg8[%c0_42, %c0_43] : memref<128x128xf32, #tpu.memory_space<vmem>>, vector<128x128xf32>
    %cst_44 = arith.constant dense<0.000000e+00> : vector<1x128xf32>
    %86 = tpu.matmul %84, %85, %cst_44 {dimension_numbers = #tpu.dot_dimension_numbers<[1], [0], [0], [1], [0, 0, 1, 1], [], []>} : vector<1x128xf32>, vector<128x128xf32>, vector<1x128xf32> -> vector<1x128xf32>
    %87 = arith.negf %86 : vector<1x128xf32>
    %88 = math.exp %87 : vector<1x128xf32>
    %cst_45 = arith.constant 1.000000e+00 : f32
    %89 = vector.broadcast %cst_45 : f32 to vector<1x128xf32>
    %90 = arith.addf %89, %88 : vector<1x128xf32>
    %91 = arith.divf %89, %90 : vector<1x128xf32>
    %92 = vector.extract_strided_slice %0 {offsets = [0, 0], sizes = [16, 128], strides = [1, 1]} : vector<32x128xbf16> to vector<16x128xbf16>
    %93 = arith.extf %92 : vector<16x128xbf16> to vector<16x128xf32>
    %94 = vector.broadcast %91 : vector<1x128xf32> to vector<16x128xf32>
    %95 = arith.mulf %80, %94 : vector<16x128xf32>
    %96 = arith.addf %95, %93 : vector<16x128xf32>
    %cst_46 = arith.constant 0.000000e+00 : f32
    %97 = vector.broadcast %cst_46 : f32 to vector<16x128xf32>
    %98 = arith.maximumf %96, %97 : vector<16x128xf32>
    %99 = arith.truncf %98 : vector<16x128xf32> to vector<16x128xbf16>
    %c0_47 = arith.constant 0 : index
    %c0_48 = arith.constant 0 : index
    %100 = vector.load %arg9[%c0_47, %c0_48] : memref<32x128xbf16, #tpu.memory_space<vmem>>, vector<16x128xbf16>
    tpu.vector_store %arg9[%c0_47, %c0_48], %99 {strides = array<i32>} : memref<32x128xbf16, #tpu.memory_space<vmem>>, vector<16x128xbf16>,
    %101 = vector.extract_strided_slice %79 {offsets = [16, 0], sizes = [16, 128], strides = [1, 1]} : vector<32x128xf32> to vector<16x128xf32>
    %cst_49 = arith.constant dense<0.000000e+00> : vector<128xf32>
    %102 = vector.multi_reduction <add>, %101, %cst_49 [0] : vector<16x128xf32> to vector<128xf32>
    %103 = vector.shape_cast %102 : vector<128xf32> to vector<1x128xf32>
    %cst_50 = arith.constant 1.600000e+01 : f32
    %104 = vector.broadcast %cst_50 : f32 to vector<1x128xf32>
    %105 = arith.divf %103, %104 : vector<1x128xf32>
    %c0_51 = arith.constant 0 : index
    %c0_52 = arith.constant 0 : index
    %106 = vector.load %arg8[%c0_51, %c0_52] : memref<128x128xf32, #tpu.memory_space<vmem>>, vector<128x128xf32>
    %cst_53 = arith.constant dense<0.000000e+00> : vector<1x128xf32>
    %107 = tpu.matmul %105, %106, %cst_53 {dimension_numbers = #tpu.dot_dimension_numbers<[1], [0], [0], [1], [0, 0, 1, 1], [], []>} : vector<1x128xf32>, vector<128x128xf32>, vector<1x128xf32> -> vector<1x128xf32>
    %108 = arith.negf %107 : vector<1x128xf32>
    %109 = math.exp %108 : vector<1x128xf32>
    %cst_54 = arith.constant 1.000000e+00 : f32
    %110 = vector.broadcast %cst_54 : f32 to vector<1x128xf32>
    %111 = arith.addf %110, %109 : vector<1x128xf32>
    %112 = arith.divf %110, %111 : vector<1x128xf32>
    %113 = vector.extract_strided_slice %0 {offsets = [16, 0], sizes = [16, 128], strides = [1, 1]} : vector<32x128xbf16> to vector<16x128xbf16>
    %114 = arith.extf %113 : vector<16x128xbf16> to vector<16x128xf32>
    %115 = vector.broadcast %112 : vector<1x128xf32> to vector<16x128xf32>
    %116 = arith.mulf %101, %115 : vector<16x128xf32>
    %117 = arith.addf %116, %114 : vector<16x128xf32>
    %cst_55 = arith.constant 0.000000e+00 : f32
    %118 = vector.broadcast %cst_55 : f32 to vector<16x128xf32>
    %119 = arith.maximumf %117, %118 : vector<16x128xf32>
    %120 = arith.truncf %119 : vector<16x128xf32> to vector<16x128xbf16>
    %c16 = arith.constant 16 : index
    %c0_56 = arith.constant 0 : index
    %121 = vector.load %arg9[%c16, %c0_56] : memref<32x128xbf16, #tpu.memory_space<vmem>>, vector<16x128xbf16>
    tpu.vector_store %arg9[%c16, %c0_56], %120 {strides = array<i32>} : memref<32x128xbf16, #tpu.memory_space<vmem>>, vector<16x128xbf16>,
    return
  }
  func.func @transform_0(%arg0: i32) -> (i32, i32) {
    %c0_i32 = arith.constant 0 : i32
    %c0_i32_0 = arith.constant 0 : i32
    return %arg0, %c0_i32 : i32, i32
  }
  func.func @transform_1(%arg0: i32) -> (i32, i32, i32) {
    %c0_i32 = arith.constant 0 : i32
    %c0_i32_0 = arith.constant 0 : i32
    %c0_i32_1 = arith.constant 0 : i32
    %c0_i32_2 = arith.constant 0 : i32
    return %c0_i32, %c0_i32_0, %c0_i32_1 : i32, i32, i32
  }
  func.func @transform_2(%arg0: i32) -> (i32, i32) {
    %c0_i32 = arith.constant 0 : i32
    %c0_i32_0 = arith.constant 0 : i32
    %c0_i32_1 = arith.constant 0 : i32
    return %c0_i32, %c0_i32_0 : i32, i32
  }
  func.func @transform_3(%arg0: i32) -> (i32, i32) {
    %c0_i32 = arith.constant 0 : i32
    %c0_i32_0 = arith.constant 0 : i32
    %c0_i32_1 = arith.constant 0 : i32
    return %c0_i32, %c0_i32_0 : i32, i32
  }
  func.func @transform_4(%arg0: i32) -> (i32, i32, i32) {
    %c0_i32 = arith.constant 0 : i32
    %c0_i32_0 = arith.constant 0 : i32
    %c0_i32_1 = arith.constant 0 : i32
    %c0_i32_2 = arith.constant 0 : i32
    return %c0_i32, %c0_i32_0, %c0_i32_1 : i32, i32, i32
  }
  func.func @transform_5(%arg0: i32) -> (i32, i32) {
    %c0_i32 = arith.constant 0 : i32
    %c0_i32_0 = arith.constant 0 : i32
    %c0_i32_1 = arith.constant 0 : i32
    return %c0_i32, %c0_i32_0 : i32, i32
  }
  func.func @transform_6(%arg0: i32) -> (i32, i32) {
    %c0_i32 = arith.constant 0 : i32
    %c0_i32_0 = arith.constant 0 : i32
    %c0_i32_1 = arith.constant 0 : i32
    return %c0_i32, %c0_i32_0 : i32, i32
  }
  func.func @transform_7(%arg0: i32) -> (i32, i32) {
    %c0_i32 = arith.constant 0 : i32
    %c0_i32_0 = arith.constant 0 : i32
    %c0_i32_1 = arith.constant 0 : i32
    return %c0_i32, %c0_i32_0 : i32, i32
  }
  func.func @transform_8(%arg0: i32) -> (i32, i32) {
    %c0_i32 = arith.constant 0 : i32
    %c0_i32_0 = arith.constant 0 : i32
    return %arg0, %c0_i32 : i32, i32
  }
}

</mosaic_0001>

<bundles_post_ra>
// kernel: tpu_custom_call.1
= control target key start
LH: loop header
LB: loop body
LE: loop exit
PB: predicated region body
PF: predicated region fallthrough
CT: control target
= control target key end

     0   :  { %s2386_s0 = inlined_call_operand.hbm [shape: bf16[64,128], index: 0, kind: input, shape index: {}]   ;;  %s2387_s1 = inlined_call_operand.hbm [shape: bf16[3,128,128], index: 1, kind: input, shape index: {}]   ;;  %s2388_s2 = inlined_call_operand.vmem [shape: f32[1,128], index: 2, kind: input, shape index: {}]   ;;  %s2389_s3 = inlined_call_operand.vmem [shape: f32[1,128], index: 3, kind: input, shape index: {}]   ;;  %s2390_s4 = inlined_call_operand.hbm [shape: bf16[3,128,128], index: 4, kind: input, shape index: {}]   ;;  %s2391_s5 = inlined_call_operand.vmem [shape: f32[1,128], index: 5, kind: input, shape index: {}]   ;;  %s2392_s6 = inlined_call_operand.vmem [shape: f32[1,128], index: 6, kind: input, shape index: {}]   ;;  %s2393_s7 = inlined_call_operand.hbm [shape: f32[128,128], index: 7, kind: input, shape index: {}]   ;;  %s2394_s8 = inlined_call_operand.hbm [shape: bf16[64,128], index: 8, kind: output, shape index: {}]  }
   0x1   :  { %2397 = sst [smem:[#allocation15_spill]] %s2387_s1 }
   0x2   :  { %2398 = sst [smem:[#allocation16_spill]] %s2390_s4 }
   0x3   :  { %13 = vsyncpa [#allocation3], 0 }
   0x4   :  { %15 = vsyncpa [#allocation3 + $0x1], 0 }
   0x5   :  { %16 = vsyncpa [#allocation6], 0 }
   0x6   :  { %17 = vsyncpa [#allocation9], 0 }
   0x7   :  { %18 = vsyncpa [#allocation4], 0 }
   0x8   :  { %20 = vsyncpa [#allocation4 + $0x1], 0  ;;  %s2065_s27 = smov 0   ;;  %s2067_s28 = smov 0  }
   0x9   :  { %s2069_s29 = smov 0   ;;  %s2071_s30 = smov 0  }
   0xa LB: > { %s2086_s9 = sadd.s32 4294967295, %s2006_s30   ;;  %s1419_s10 = sadd.s32 4294967294, %s2006_s30   ;;  %s2006_s30 = sphi %s2071_s30, %s2431_s30   ;;  %s2002_s29 = sphi %s2069_s29, %s2430_s29   ;;  %s1998_s28 = sphi %s2067_s28, %s2429_s28   ;;  %s1994_s27 = sphi %s2065_s27, %s2428_s27  }
   0xb   : > { %p46_p0 = scmp.ne.s32.totalorder %s1998_s28, %s1994_s27  ;;  %p47_p1 = scmp.eq.s32.totalorder %s2086_s9, 0 }
   0xc   : > { %p217_p2 = scmp.eq.s32.totalorder %s2086_s9, 1  ;;  %p223_p3 = scmp.eq.s32.totalorder %s1419_s10, 1 }
   0xd   : > { %p2095_p4 = por %p47_p1, %p46_p0  ;;  %p1420_p5 = scmp.ge.s32.totalorder %s2006_s30, 1 }
   0xe   : > { %p2100_p6 = por %p223_p3, %p46_p0  ;;  %p230_p7 = scmp.lt.s32.totalorder %s2006_s30, 3 }
   0xf   : > { %s2401_s1 = sld [smem:[#allocation15_spill]]  ;;  %s2008_s17 = smov [#allocation5]  }
  0x10   : > { %p2108_p8 = pnand %p1420_p5, %p230_p7  ;;  %s243_s18 = sshll.u32 %s2008_s17, 4  ;;  %s244_s18 = int_to_ptr.vmem [resolvable:$true] %s243_s18 }
  0x11   : > { %s2404_s4 = sld [smem:[#allocation16_spill]]  ;;  %s2395_s23 = smov 64  }
  0x12   : > { %p1728_p9 = pneg %p2108_p8  ;;  %s2396_s24 = smov 4  }
  0x13   : > { %s2011_s25 = smov [#allocation7]   ;;  %s281_s14 = sshll.u32 %s2393_s7, 4  ;;  %s282_s14 = int_to_ptr.hbm [resolvable:$true] %s281_s14 }
  0x14   : > { %p2116_p10 = pnand %p1728_p9, %p47_p1  ;;  %s263_s26 = sshll.u32 %s2011_s25, 4  ;;  %s264_s26 = int_to_ptr.vmem [resolvable:$true] %s263_s26 }
  0x15   : > { %s241_s15 = sshll.u32 %s2401_s1, 4  ;;  %s2014_s20 = smov 8   ;;  %s242_s15 = int_to_ptr.hbm [resolvable:$true] %s241_s15 }
  0x16   : > { %1731 = dma.hbm_to_vmem [thread:$0]  (!%p2116_p10), %s242_s15, 3072, %s244_s18, [#allocation6], %s2395_s23, %s2395_s23, %s2396_s24  }
  0x17   : > { %s261_s22 = sshll.u32 %s2404_s4, 4  ;;  %s2012_s15 = smov [#allocation8]   ;;  %s262_s22 = int_to_ptr.hbm [resolvable:$true] %s261_s22 }
  0x18   : > { %1734 = dma.hbm_to_vmem [thread:$0]  (!%p2116_p10), %s262_s22, 3072, %s264_s26, [#allocation6], %s2395_s23, %s2395_s23, %s2396_s24  }
  0x19   : > { %s283_s17 = sshll.u32 %s2012_s15, 4  ;;  %s2013_s18 = smov 128   ;;  %s284_s17 = int_to_ptr.vmem [resolvable:$true] %s283_s17 }
  0x1a   : > { %1737 = dma.hbm_to_vmem [thread:$0]  (!%p2116_p10), %s282_s14, 2048, %s284_s17, [#allocation9], %s2013_s18, %s2013_s18, %s2014_s20  }
  0x1b   : > { %s2140_s21 = sadd.s32 1, %s2006_s30   ;;  %s33_s10 = sadd.s32 1, %s2002_s29 }
  0x1c   : > { %s30_s25 = ssub.s32 %s2006_s30, %s2140_s21  ;;  %p40_p13 = scmp.ne.s32.totalorder %s2002_s29, %s1998_s28 }
  0x1d   : > { %p31_p12 = scmp.eq.s32.totalorder %s30_s25, 0  ;;  %p41_p0 = scmp.eq.s32.totalorder %s2006_s30, 0 }
  0x1e   : > { %p2153_p3 = por %p217_p2, %p40_p13  ;;  %p1749_p5 = scmp.lt.s32.totalorder %s2006_s30, 2 }
  0x1f   : > { %s2149_s13 = scalar_select %p31_p12, %s2002_s29, %s33_s10  }
  0x20   : > { %s297_s26 = sand.u32 1, %s2002_s29   ;;  %s1649_s15 = sshll.u32 %s2006_s30, 4 }
  0x21   : > { %p42_p7 = por %p41_p0, %p40_p13  ;;  %s1425_s19 = sshll.u32 %s297_s26, 4 }
  0x22   : > { %s306_s18 = scalar_lea.hbm %s2386_s0, %s1649_s15  ;;  %s301_s25 = scalar_lea.vmem [#allocation2], %s1425_s19 }
  0x23   : > { %s307_s20 = sshll.u32 %s306_s18, 4  ;;  %s309_s23 = sshll.u32 %s301_s25, 4  ;;  %s308_s20 = int_to_ptr.hbm [resolvable:$true] %s307_s20  ;;  %s310_s23 = int_to_ptr.vmem [resolvable:$true] %s309_s23 }
  0x24   : > { %p2163_p9 = pnand %p1749_p5, %p42_p7  ;;  %s298_s24 = scalar_lea.sflag [#allocation3], %s297_s26 }
  0x25   : > { %s1902_s1 = sshra.s32 %s308_s20, 4  ;;  %s1909_s19 = scalar_lea.hbm %s2386_s0, 32  ;;  %s1903_s1 = int_to_ptr.hbm [resolvable:$true] %s1902_s1 }
  0x26   : > { %s1904_s4 = scalar_lea.hbm %s1903_s1, 16  ;;  %p1906_p10 = pneg %p2163_p9 }
  0x27   : > { %p1905_p2 = scmp.ne.s32.totalorder %s1903_s1, %s1904_s4  ;;  %p1910_p0 = scmp.lt.s32.totalorder %s1903_s1, %s2386_s0 }
  0x28   : > { %p1911_p5 = scmp.lt.s32.totalorder %s1909_s19, %s1904_s4 }
  0x29   : > { %p1907_p12 = pnand %p1906_p10, %p1905_p2 }
  0x2a   : > { %p1912_p7 = por %p1911_p5, %p1910_p0 }
  0x2b   : > { %p1908_p13 = pneg %p1907_p12 }
  0x2d   : > { %p1913_p11 = pnand %p1912_p7, %p1908_p13 }
  0x2f   : > { %1916 = shalt.err (!%p1913_p11)
}
  0x30   : > { %s2407_s26 = smov 4   ;;  %s2408_s25 = smov 64  }
  0x31   : > { %1741 = dma.hbm_to_vmem [thread:$0]  (!%p2163_p9), %s308_s20, 256, %s310_s23, %s298_s24, %s2408_s25, %s2408_s25, %s2407_s26  }
  0x32   : > { %321 = sbr.rel (%p2108_p8) target bundleno = 616 (0x268), region = 52  ;;  %s2183_s15 = sand.u32 (!%p2108_p8), 1, %s1998_s28  }
  0x33   : > { %s1429_s1 = sshll.u32 (!%p2108_p8), %s2183_s15, 4  ;;  %s324_s4 = scalar_lea.sflag (!%p2108_p8), [#allocation3], %s2183_s15 }
  0x34   : > { %s2189_s14 = scalar_lea.vmem (!%p2108_p8), [#allocation2], %s1429_s1 }
  0x37   : > { %1977 = dma.done.wait (%p2095_p4), %s324_s4, 256  }
  0x38   : > { %1979 = vsyncadd (%p2095_p4), %s324_s4, 4294967040 }
  0x39   : > { %1981 = dma.done.wait (%p47_p1), [#allocation6], 6144  }
  0x3a   : > { %1983 = vsyncadd (%p47_p1), [#allocation6], 4294961152 }
  0x3b   : > { %1985 = dma.done.wait (%p47_p1), [#allocation9], 2048  }
  0x3c   : > { %1987 = vsyncadd (%p47_p1), [#allocation9], 4294965248  ;;  %v385_v0 = vlaneseq  ;;  %v1667_v2 = vld [vmem:[#allocation5 + $0x78] sm:$0xff]  ;;  %v1666_v6 = vld [vmem:[#allocation5 + $0x70] sm:$0xff]  ;;  %vm2015_vm1 = vmmov 1   ;;  %v2016_v19 = vmov 0  }
  0x3d   : > { %v1659_v3 = vld [vmem:[#allocation5 + $0x38] sm:$0xff]  ;;  %631 = vmatpush.bf16.msra.mxu0 %v1667_v2  ;;  %v1658_v7 = vld [vmem:[#allocation5 + $0x30] sm:$0xff]  ;;  %v1665_v11 = vld [vmem:[#allocation5 + $0x68] sm:$0xff]  ;;  %v2224_v40 = vunpack.c.l.b16 %v2016_v19  ;;  %v2227_v41 = vunpack.c.h.b16 %v2016_v19  ;;  %vm456_vm6 = vsmask.f32 256  ;;  %vm474_vm7 = vcmask 1040384  }
  0x3e   : > { %v386_v1 = vshrl.u32 %v385_v0, 7  ;;  %v1675_v4 = vld [vmem:[#allocation5 + $0xb8] sm:$0xff]  ;;  %698 = vmatpush.bf16.msra.mxu1 %v1659_v3  ;;  %v1674_v8 = vld [vmem:[#allocation5 + $0xb0] sm:$0xff]  ;;  %v1657_v12 = vld [vmem:[#allocation5 + $0x28] sm:$0xff]  ;;  %vm507_vm13 = vsmask.f32 7424 }
  0x3f   : > { %782 = vmatpush.bf16.msra.mxu2 %v1675_v4  ;;  %v1673_v13 = vld [vmem:[#allocation5 + $0xa8] sm:$0xff]  ;;  %v1664_v14 = vld [vmem:[#allocation5 + $0x60] sm:$0xff]  ;;  %vm478_vm2 = vmpackc.low %vm2015_vm1, %vm2015_vm1  ;;  %s375_s18 = scalar_lea.vmem [#allocation10], %s1429_s1  ;;  %s1700_s26 = sshll.u32 %s2086_s9, 4 }
  0x40   : > { %v387_v5 = vadd.s32 8, %v386_v1  ;;  %v394_v9 = vand.u32 15, %v386_v1  ;;  %v1656_v16 = vld [vmem:[#allocation5 + $0x20] sm:$0xff]  ;;  %v482_v21 = vsel %vm478_vm2, 65537, %v2016_v19  ;;  %v1663_v22 = vld [vmem:[#allocation5 + $0x58] sm:$0xff]  ;;  %v388_v25 = vadd.s32 16, %v386_v1  ;;  %vm2240_vm10 = vmand %vm474_vm7, %vm456_vm6  ;;  %s1313_s11 = scalar_lea.hbm %s2394_s8, %s1700_s26 }
  0x41   : > { %632 = vmatpush.bf16.msra.mxu0 %v1666_v6  ;;  %v1672_v17 = vld [vmem:[#allocation5 + $0xa0] sm:$0xff]  ;;  %v1655_v23 = vld [vmem:[#allocation5 + $0x18] sm:$0xff]  ;;  %v389_v28 = vadd.s32 24, %v386_v1  ;;  %v486_v31 = vunpack.c.l.b16 %v482_v21  ;;  %v1662_v34 = vld [vmem:[#allocation5 + $0x50] sm:$0xff]  ;;  %s1314_s1 = sshll.u32 %s375_s18, 4  ;;  %s1302_s9 = scalar_lea.sflag [#allocation4], %s2183_s15  ;;  %s1315_s1 = int_to_ptr.vmem [resolvable:$true] %s1314_s1 }
  0x42   : > { %v401_v10 = vand.u32 15, %v387_v5  ;;  %699 = vmatpush.bf16.msra.mxu1 %v1658_v7  ;;  %vm438_vm0 = vcmp.gt.s32.totalorder %v394_v9, 0  ;;  %v2208_v18 = vld [vmem:[%s2189_s14] sm:$0xff]  ;;  %v1671_v26 = vld [vmem:[#allocation5 + $0x98] sm:$0xff]  ;;  %v408_v36 = vand.u32 15, %v388_v25  ;;  %v1661_v48 = vld [vmem:[#allocation5 + $0x48] sm:$0xff] }
  0x43   : > { %783 = vmatpush.bf16.msra.mxu2 %v1674_v8  ;;  %vm477_vm4 = vmpackc.low %vm438_vm0, %vm438_vm0  ;;  %v458_v27 = vshrl.u32 %v2208_v18, 16  ;;  %v461_v29 = vshll.u32 %v2208_v18, 16  ;;  %v2219_v32 = vld [vmem:[%s2189_s14 + $0x8] sm:$0xff]  ;;  %v1654_v35 = vld [vmem:[#allocation5 + $0x10] sm:$0xff]  ;;  %v415_v42 = vand.u32 15, %v389_v28  ;;  %v1443_v44 = vunpack.i.l.s16 %v486_v31  ;;  %s1952_s10 = scalar_lea.hbm %s2394_s8, 32 }
  0x44   : > { %vm2203_vm3 = vcmp.lt.s32.totalorder %v401_v10, 15  ;;  %v481_v20 = vsel %vm477_vm4, 65537, %v2016_v19  ;;  %v1691_v37 = vld [vmem:[#allocation7 + $0x78] sm:$0xff]  ;;  %v1670_v38 = vld [vmem:[#allocation5 + $0x90] sm:$0xff]  ;;  %v468_v46 = vshll.u32 %v2219_v32, 16  ;;  %v1653_v49 = vld [vmem:[#allocation5 + $0x8] sm:$0xff] }
  0x45   : > { %633 = vmatpush.bf16.msra.mxu0 %v1665_v11  ;;  %vm519_vm5 = vmpackc.low %vm2203_vm3, %vm2203_vm3  ;;  %v485_v30 = vunpack.c.l.b16 %v481_v20  ;;  %v2221_v39 = vrot.slane %v458_v27, 7  ;;  %v508_v45 = vrot.slane %v461_v29, 1  ;;  %952 = vmatpush.bf16.msra.mxu3 %v1691_v37  ;;  %vm2230_vm8 = vcmp.gt.s32.totalorder %v408_v36, 0  ;;  %v1669_v51 = vld [vmem:[#allocation5 + $0x88] sm:$0xff]  ;;  %v1660_v57 = vld [vmem:[#allocation5 + $0x40] sm:$0xff] }
  0x46   : > { %700 = vmatpush.bf16.msra.mxu1 %v1657_v12  ;;  %v523_v24 = vsel %vm519_vm5, 65537, %v2016_v19  ;;  %vm2235_vm9 = vcmp.lt.s32.totalorder %v415_v42, 15  ;;  %vm496_vm12 = vcmp.ne.s32.totalorder %v1443_v44, %v2227_v41  ;;  %v510_v56 = vrot.slane %v468_v46, 1  ;;  %vm479_vm0 = vmpackc.low %vm2230_vm8, %vm2230_vm8  ;;  %v1652_v58 = vld [vmem:[#allocation5] sm:$0xff]  ;;  %v1689_v20 = vld [vmem:[#allocation7 + $0x68] sm:$0xff] }
  0x47   : > { %784 = vmatpush.bf16.msra.mxu2 %v1673_v13  ;;  %v527_v33 = vunpack.c.l.b16 %v523_v24  ;;  %v1442_v43 = vunpack.i.l.s16 %v485_v30  ;;  %v463_v52 = vor.u32 %v461_v29, %v2221_v39  ;;  %v509_v55 = vor.u32 %v508_v45, %v458_v27  ;;  %vm521_vm1 = vmpackc.low %vm2235_vm9, %vm2235_vm9  ;;  %v1668_v59 = vld [vmem:[#allocation5 + $0x80] sm:$0xff]  ;;  %v1683_v21 = vld [vmem:[#allocation7 + $0x38] sm:$0xff] }
  0x48   : > { %vm536_vm14 = vcmp.ne.s32.totalorder %v1443_v44, %v2224_v40  ;;  %v483_v0 = vsel %vm479_vm0, 65537, %v2016_v19  ;;  %v525_v2 = vsel %vm521_vm1, 65537, %v2016_v19  ;;  %v465_v4 = vshrl.u32 %v2219_v32, 16  ;;  %v1690_v19 = vld [vmem:[#allocation7 + $0x70] sm:$0xff]  ;;  %v1687_v24 = vld [vmem:[#allocation7 + $0x58] sm:$0xff]  ;;  %v1681_v25 = vld [vmem:[#allocation7 + $0x28] sm:$0xff] }
  0x49   : > { %634 = vmatpush.bf16.msra.mxu0 %v1664_v14  ;;  %v1447_v47 = vunpack.i.l.s16 %v527_v33  ;;  %vm495_vm11 = vcmp.ne.s32.totalorder %v1442_v43, %v2224_v40  ;;  %v476_v60 = vsel %vm2240_vm10, 0, %v463_v52  ;;  %v511_v62 = vsel %vm507_vm13, %v509_v55, %v510_v56  ;;  %953 = vmatpush.bf16.msra.mxu3 %v1690_v19  ;;  %v1680_v27 = vld [vmem:[#allocation7 + $0x20] sm:$0xff]  ;;  %v1699_v28 = vld [vmem:[#allocation7 + $0xb8] sm:$0xff]  ;;  %v1685_v29 = vld [vmem:[#allocation7 + $0x48] sm:$0xff] }
  0x4a   : > { %701 = vmatpush.bf16.msra.mxu1 %v1656_v16  ;;  %vm2260_vm2 = vmpackc.low %vm496_vm12, %vm495_vm11  ;;  %v487_v5 = vunpack.c.l.b16 %v483_v0  ;;  %v529_v6 = vunpack.c.l.b16 %v525_v2  ;;  %v467_v7 = vrot.slane %v465_v4, 7  ;;  %vm515_vm4 = vcmask 1047552   ;;  %v1679_v30 = vld [vmem:[#allocation7 + $0x18] sm:$0xff]  ;;  %v1698_v31 = vld [vmem:[#allocation7 + $0xb0] sm:$0xff] }
  0x4b   : > { %785 = vmatpush.bf16.msra.mxu2 %v1672_v17  ;;  %vm537_vm15 = vcmp.ne.s32.totalorder %v1447_v47, %v2227_v41  ;;  %v505_v1 = vsel %vm2260_vm2, %v476_v60, 0  ;;  %v512_v11 = vor.u32 %v510_v56, %v465_v4  ;;  %vm2281_vm7 = vmand %vm515_vm4, %vm507_vm13  ;;  %v1678_v33 = vld [vmem:[#allocation7 + $0x10] sm:$0xff]  ;;  %v1696_v36 = vld [vmem:[#allocation7 + $0xa0] sm:$0xff] }
  0x4c   : > { %vm2267_vm3 = vmpackc.low %vm537_vm15, %vm536_vm14  ;;  %v1444_v8 = vunpack.i.l.s16 %v487_v5  ;;  %v1449_v9 = vunpack.i.l.s16 %v529_v6  ;;  %v470_v10 = vor.u32 %v468_v46, %v467_v7  ;;  %v1798_v42 = vld [vmem:[%s2388_s2] ss:$0 sm:$0xff]  ;;  %v1694_v44 = vld [vmem:[#allocation7 + $0x90] sm:$0xff] }
  0x4d   : > { %635 = vmatpush.bf16.msra.mxu0 %v1663_v22  ;;  %v546_v3 = vsel %vm2267_vm3, %v511_v62, 0  ;;  %v517_v15 = vsel %vm2281_vm7, %v512_v11, 0  ;;  %954 = vmatpush.bf16.msra.mxu3 %v1689_v20  ;;  %v1688_v22 = vld [vmem:[#allocation7 + $0x60] sm:$0xff]  ;;  %v1171_v63 = vld [vmem:[#allocation8 + $0x70] sm:$0xff]  ;;  %v1166_v16 = vld [vmem:[#allocation8 + $0x48] sm:$0xff] }
  0x4e   : > { %702 = vmatpush.bf16.msra.mxu1 %v1655_v23  ;;  %vm502_vm5 = vcmp.ne.s32.totalorder %v1444_v8, %v2224_v40  ;;  %vm544_vm8 = vcmp.ne.s32.totalorder %v1449_v9, %v2227_v41  ;;  %v471_v13 = vsel %vm456_vm6, %v2221_v39, %v470_v10  ;;  %v1682_v23 = vld [vmem:[#allocation7 + $0x30] sm:$0xff]  ;;  %v1676_v39 = vld [vmem:[#allocation7] sm:$0xff]  ;;  %v1695_v40 = vld [vmem:[#allocation7 + $0x98] sm:$0xff] }
  0x4f   : > { %786 = vmatpush.bf16.msra.mxu2 %v1671_v26  ;;  %vm2290_vm9 = vmpackc.low %vm496_vm12, %vm502_vm5  ;;  %v1686_v26 = vld [vmem:[#allocation7 + $0x50] sm:$0xff]  ;;  %v1799_v50 = vld [vmem:[%s2389_s3] ss:$0 sm:$0xff] }
  0x50   : > { %vm2298_vm11 = vmpackc.low %vm544_vm8, %vm536_vm14  ;;  %v506_v17 = vsel %vm2290_vm9, %v471_v13, 0  ;;  %v1692_v53 = vld [vmem:[#allocation7 + $0x80] sm:$0xff]  ;;  %v1167_v12 = vld [vmem:[#allocation8 + $0x50] sm:$0xff] }
  0x51   : > { %636 = vmatpush.bf16.msra.mxu0 %v1662_v34  ;;  %955 = vmatpush.bf16.msra.mxu3 %v1688_v22  ;;  %v1697_v34 = vld [vmem:[#allocation7 + $0xa8] sm:$0xff]  ;;  %v1169_v14 = vld [vmem:[#allocation8 + $0x60] sm:$0xff] }
  0x52   : > { %703 = vmatpush.bf16.msra.mxu1 %v1654_v35  ;;  %v1677_v35 = vld [vmem:[#allocation7 + $0x8] sm:$0xff] }
  0x53   : > { %787 = vmatpush.bf16.msra.mxu2 %v1670_v38 }
  0x55   : > { %637 = vmatpush.bf16.msra.mxu0 %v1661_v48  ;;  %956 = vmatpush.bf16.msra.mxu3 %v1687_v24  ;;  %v1693_v48 = vld [vmem:[#allocation7 + $0x88] sm:$0xff] }
  0x56   : > { %704 = vmatpush.bf16.msra.mxu1 %v1653_v49 }
  0x57   : > { %788 = vmatpush.bf16.msra.mxu2 %v1669_v51 }
  0x59   : > { %638 = vmatpush.bf16.msra.mxu0 %v1660_v57  ;;  %957 = vmatpush.bf16.msra.mxu3 %v1686_v26 }
  0x5a   : > { %705 = vmatpush.bf16.msra.mxu1 %v1652_v58 }
  0x5b   : > { %789 = vmatpush.bf16.msra.mxu2 %v1668_v59 }
  0x5c   : > { %639 = vmatmul.bf16.vlgmr.msra.gmra.mxu0 %v2208_v18  ;;  %v547_v18 = vsel %vm2298_vm11, %v517_v15, 0 }
  0x5d   : > { %706 = vmatmul.bf16.vlgmr.msra.gmra.mxu1 %v505_v1  ;;  %1019 = vmatpush.bf16.msrb.mxu0 %v1683_v21 }
  0x5e   : > { %790 = vmatmul.bf16.vlgmr.msra.gmra.mxu2 %v546_v3  ;;  %1103 = vmatpush.bf16.msrb.mxu1 %v1699_v28 }
  0x5f   : > { %958 = vmatpush.bf16.msra.mxu3 %v1685_v29 }
  0x61   : > { %1020 = vmatpush.bf16.msrb.mxu0 %v1682_v23 }
  0x62   : > { %1104 = vmatpush.bf16.msrb.mxu1 %v1698_v31 }
  0x65   : > { %1021 = vmatpush.bf16.msrb.mxu0 %v1681_v25 }
  0x66   : > { %1105 = vmatpush.bf16.msrb.mxu1 %v1697_v34 }
  0x69   : > { %1022 = vmatpush.bf16.msrb.mxu0 %v1680_v27 }
  0x6a   : > { %1106 = vmatpush.bf16.msrb.mxu1 %v1696_v36 }
  0x6c   : > { %644 = vmatmul.bf16.gmra.mxu0 %v2219_v32  ;;  %v1684_v32 = vld [vmem:[#allocation7 + $0x40] sm:$0xff] }
  0x6d   : > { %711 = vmatmul.bf16.gmra.mxu1 %v506_v17  ;;  %1023 = vmatpush.bf16.msrb.mxu0 %v1679_v30 }
  0x6e   : > { %795 = vmatmul.bf16.gmra.mxu2 %v547_v18  ;;  %959 = vmatpush.bf16.msra.mxu3 %v1684_v32 }
  0x6f   : > { %1107 = vmatpush.bf16.msrb.mxu1 %v1695_v40 }
  0x71   : > { %1024 = vmatpush.bf16.msrb.mxu0 %v1678_v33 }
  0x73   : > { %1108 = vmatpush.bf16.msrb.mxu1 %v1694_v44 }
  0x75   : > { %1025 = vmatpush.bf16.msrb.mxu0 %v1677_v35 }
  0x77   : > { %1109 = vmatpush.bf16.msrb.mxu1 %v1693_v48  ;;  %v1168_v48 = vld [vmem:[#allocation8 + $0x58] sm:$0xff] }
  0x79   : > { %1026 = vmatpush.bf16.msrb.mxu0 %v1676_v39 }
  0x7b   : > { %1110 = vmatpush.bf16.msrb.mxu1 %v1692_v53  ;;  %v1161_v53 = vld [vmem:[#allocation8 + $0x20] sm:$0xff] }
  0xd9   : > { %v640_v37 = vpop.f32.mrf.mxu0 }
  0xda   : > { %v707_v38 = vpop.f32.mrf.mxu1 }
  0xdb   : > { %v708_v41 = vadd.f32 %v707_v38, %v640_v37 }
  0xe1   : > { %v791_v43 = vpop.f32.mrf.mxu2  ;;  %v642_v46 = vpop.f32.mrf.mxu0 }
  0xe2   : > { %v801_v45 = vadd.f32 %v791_v43, %v708_v41  ;;  %v709_v47 = vpop.f32.mrf.mxu1 }
  0xe3   : > { %v710_v52 = vadd.f32 %v709_v47, %v642_v46  ;;  %v1172_v46 = vld [vmem:[#allocation8 + $0x78] sm:$0xff]  ;;  %v1170_v47 = vld [vmem:[#allocation8 + $0x68] sm:$0xff] }
  0xe4   : > { %v809_v49 = vmul.f32 %v1798_v42, %v801_v45  ;;  %1173 = vmatpush.msrb.mxu2 %v1172_v46  ;;  %1249 = vmatpush.msrb.mxu3 %v1172_v46 }
  0xe6   : > { %v817_v51 = vadd.f32 %v1799_v50, %v809_v49  ;;  %1174 = vmatpush.msrb.mxu2 %v1171_v63  ;;  %1250 = vmatpush.msrb.mxu3 %v1171_v63  ;;  %v1165_v49 = vld [vmem:[#allocation8 + $0x40] sm:$0xff] }
  0xe8   : > { %v821_v59 = vmax.f32 %v817_v51, 0.0  ;;  %1175 = vmatpush.msrb.mxu2 %v1170_v47  ;;  %1251 = vmatpush.msrb.mxu3 %v1170_v47  ;;  %v1163_v51 = vld [vmem:[#allocation8 + $0x30] sm:$0xff] }
  0xe9   : > { %v793_v55 = vpop.f32.mrf.mxu2  ;;  %v645_v57 = vpop.f32.mrf.mxu0 }
  0xea   : > { %v802_v56 = vadd.f32 %v793_v55, %v710_v52  ;;  %v712_v58 = vpop.f32.mrf.mxu1  ;;  %v825_v1 = vpack.c.bf16 %v821_v59, %v821_v59  ;;  %1176 = vmatpush.msrb.mxu2 %v1169_v14  ;;  %1252 = vmatpush.msrb.mxu3 %v1169_v14  ;;  %v1162_v52 = vld [vmem:[#allocation8 + $0x28] sm:$0xff] }
  0xeb   : > { %v713_v0 = vadd.f32 %v712_v58, %v645_v57  ;;  %v1159_v58 = vld [vmem:[#allocation8 + $0x10] sm:$0xff]  ;;  %v1158_v59 = vld [vmem:[#allocation8 + $0x8] sm:$0xff] }
  0xec   : > { %v810_v60 = vmul.f32 %v1798_v42, %v802_v56  ;;  %v833_v7 = vunpack.c.l.b16 %v825_v1  ;;  %1177 = vmatpush.msrb.mxu2 %v1168_v48  ;;  %1253 = vmatpush.msrb.mxu3 %v1168_v48  ;;  %v1160_v56 = vld [vmem:[#allocation8 + $0x18] sm:$0xff]  ;;  %v2017_v1 = vmov 16.0  }
  0xed   : > { %1802 = vrcp.f32 %v2017_v1 }
  0xee   : > { %v818_v62 = vadd.f32 %v1799_v50, %v810_v60  ;;  %1178 = vmatpush.msrb.mxu2 %v1167_v12  ;;  %1254 = vmatpush.msrb.mxu3 %v1167_v12  ;;  %v1157_v60 = vld [vmem:[#allocation8] sm:$0xff] }
  0xf0   : > { %v822_v2 = vmax.f32 %v818_v62, 0.0  ;;  %1179 = vmatpush.msrb.mxu2 %v1166_v16  ;;  %1255 = vmatpush.msrb.mxu3 %v1166_v16 }
  0xf1   : > { %v796_v3 = vpop.f32.mrf.mxu2  ;;  %v647_v9 = vpop.f32.mrf.mxu0 }
  0xf2   : > { %v826_v4 = vpack.c.bf16 %v822_v2, %v822_v2  ;;  %v803_v5 = vadd.f32 %v796_v3, %v713_v0  ;;  %v714_v10 = vpop.f32.mrf.mxu1  ;;  %1180 = vmatpush.msrb.mxu2 %v1165_v49  ;;  %1256 = vmatpush.msrb.mxu3 %v1165_v49 }
  0xf3   : > { %v715_v15 = vadd.f32 %v714_v10, %v647_v9  ;;  %v1801_v10 = vld [vmem:[%s2392_s6] ss:$0 sm:$0xff] }
  0xf4   : > { %v811_v6 = vmul.f32 %v1798_v42, %v803_v5  ;;  %v834_v8 = vunpack.c.l.b16 %v826_v4  ;;  %v1800_v5 = vld [vmem:[%s2391_s5] ss:$0 sm:$0xff] }
  0xf6   : > { %v837_v11 = vpack.c.b16 %v834_v8, %v833_v7  ;;  %v819_v13 = vadd.f32 %v1799_v50, %v811_v6  ;;  %v1803_v6 = vpop.eup %1802 }
  0xf8   : > { %v840_v17 = vshrl.u32 %v837_v11, 16  ;;  %960 = vmatmul.bf16.vlgmr.msra.gmra.mxu3 %v837_v11  ;;  %v843_v21 = vshll.u32 %v837_v11, 16  ;;  %v823_v22 = vmax.f32 %v819_v13, 0.0 }
  0xf9   : > { %v798_v18 = vpop.f32.mrf.mxu2 }
  0xfa   : > { %v804_v19 = vadd.f32 %v798_v18, %v715_v15  ;;  %v842_v20 = vrot.slane %v840_v17, 7  ;;  %v827_v28 = vpack.c.bf16 %v823_v22, %v823_v22  ;;  %v859_v33 = vrot.slane %v843_v21, 1 }
  0xfb   : > { %v1150_v15 = vmul.f32 16.0, %v1803_v6 }
  0xfc   : > { %v812_v23 = vmul.f32 %v1798_v42, %v804_v19  ;;  %v845_v24 = vor.u32 %v843_v21, %v842_v20  ;;  %v835_v31 = vunpack.c.l.b16 %v827_v28  ;;  %v860_v37 = vor.u32 %v859_v33, %v840_v17 }
  0xfd   : > { %v1151_v21 = vsub.f32 1.0, %v1150_v15 }
  0xfe   : > { %v820_v25 = vadd.f32 %v1799_v50, %v812_v23  ;;  %v856_v26 = vsel %vm2240_vm10, 0, %v845_v24  ;;  %v1164_v50 = vld [vmem:[#allocation8 + $0x38] sm:$0xff] }
  0xff   : > { %v857_v27 = vsel %vm2260_vm2, %v856_v26, 0  ;;  %1181 = vmatpush.msrb.mxu2 %v1164_v50  ;;  %1257 = vmatpush.msrb.mxu3 %v1164_v50 }
 0x100   : > { %v824_v29 = vmax.f32 %v820_v25, 0.0  ;;  %1027 = vmatmul.bf16.vlgmr.msrb.gmra.mxu0 %v857_v27  ;;  %v1152_v25 = vmul.f32 %v1803_v6, %v1151_v21 }
 0x101   : > { %1182 = vmatpush.msrb.mxu2 %v1163_v51  ;;  %1258 = vmatpush.msrb.mxu3 %v1163_v51 }
 0x102   : > { %v828_v30 = vpack.c.bf16 %v824_v29, %v824_v29 }
 0x103   : > { %1183 = vmatpush.msrb.mxu2 %v1162_v52  ;;  %1259 = vmatpush.msrb.mxu3 %v1162_v52 }
 0x104   : > { %v836_v32 = vunpack.c.l.b16 %v828_v30 }
 0x105   : > { %1184 = vmatpush.msrb.mxu2 %v1161_v53  ;;  %1260 = vmatpush.msrb.mxu3 %v1161_v53 }
 0x106   : > { %v838_v34 = vpack.c.b16 %v836_v32, %v835_v31  ;;  %v1153_v32 = vadd.f32 %v1803_v6, %v1152_v25 }
 0x107   : > { %1185 = vmatpush.msrb.mxu2 %v1160_v56  ;;  %1261 = vmatpush.msrb.mxu3 %v1160_v56 }
 0x108   : > { %v847_v35 = vshrl.u32 %v838_v34, 16  ;;  %v850_v36 = vshll.u32 %v838_v34, 16  ;;  %965 = vmatmul.bf16.gmra.mxu3 %v838_v34 }
 0x109   : > { %1186 = vmatpush.msrb.mxu2 %v1159_v58  ;;  %1262 = vmatpush.msrb.mxu3 %v1159_v58 }
 0x10a   : > { %v861_v38 = vrot.slane %v850_v36, 1  ;;  %v849_v39 = vrot.slane %v847_v35, 7 }
 0x10b   : > { %1187 = vmatpush.msrb.mxu2 %v1158_v59  ;;  %1263 = vmatpush.msrb.mxu3 %v1158_v59 }
 0x10c   : > { %v862_v54 = vsel %vm507_vm13, %v860_v37, %v861_v38  ;;  %v852_v40 = vor.u32 %v850_v36, %v849_v39  ;;  %v863_v43 = vor.u32 %v861_v38, %v847_v35 }
 0x10d   : > { %v867_v61 = vsel %vm2267_vm3, %v862_v54, 0  ;;  %1188 = vmatpush.msrb.mxu2 %v1157_v60  ;;  %1264 = vmatpush.msrb.mxu3 %v1157_v60 }
 0x10e   : > { %1111 = vmatmul.bf16.vlgmr.msrb.gmra.mxu1 %v867_v61  ;;  %v853_v41 = vsel %vm456_vm6, %v842_v20, %v852_v40  ;;  %v866_v44 = vsel %vm2281_vm7, %v863_v43, 0  ;;  %vm1154_vm6 = vweird.f32 %v1803_v6 }
 0x10f   : > { %v858_v42 = vsel %vm2290_vm9, %v853_v41, 0  ;;  %v868_v45 = vsel %vm2298_vm11, %v866_v44, 0  ;;  %v1155_v39 = vsel %vm1154_vm6, %v1803_v6, %v1153_v32 }
 0x110   : > { %1032 = vmatmul.bf16.gmra.mxu0 %v858_v42 }
 0x11e   : > { %1116 = vmatmul.bf16.gmra.mxu1 %v868_v45 }
 0x17b   : > { %v961_v57 = vpop.f32.mrf.mxu3 }
 0x17d   : > { %v1028_v55 = vpop.f32.mrf.mxu0 }
 0x17e   : > { %v1029_v3 = vadd.f32 %v1028_v55, %v961_v57 }
 0x183   : > { %v963_v2 = vpop.f32.mrf.mxu3 }
 0x185   : > { %v1030_v62 = vpop.f32.mrf.mxu0 }
 0x186   : > { %v1031_v7 = vadd.f32 %v1030_v62, %v963_v2 }
 0x18b   : > { %v1112_v0 = vpop.f32.mrf.mxu1  ;;  %v966_v18 = vpop.f32.mrf.mxu3 }
 0x18c   : > { %v1122_v4 = vadd.f32 %v1112_v0, %v1029_v3  ;;  %v381_v0 = vld [vmem:[%s2189_s14] sm:$0xff]  }
 0x18d   : > { %v1033_v13 = vpop.f32.mrf.mxu0  ;;  %v1213_v6 = vunpack.c.h.bf16 %v381_v0 }
 0x18e   : > { %v1130_v9 = vmul.f32 %v1800_v5, %v1122_v4  ;;  %v1034_v26 = vadd.f32 %v1033_v13, %v966_v18 }
 0x190   : > { %v2333_v19 = vadd.f32 %v1801_v10, %v1130_v9 }
 0x193   : > { %v1114_v8 = vpop.f32.mrf.mxu1  ;;  %v968_v31 = vpop.f32.mrf.mxu3 }
 0x194   : > { %v1123_v11 = vadd.f32 %v1114_v8, %v1031_v7 }
 0x195   : > { %v1035_v28 = vpop.f32.mrf.mxu0 }
 0x196   : > { %v1131_v17 = vmul.f32 %v1800_v5, %v1123_v11  ;;  %v1036_v33 = vadd.f32 %v1035_v28, %v968_v31 }
 0x198   : > { %v2335_v20 = vadd.f32 %v1801_v10, %v1131_v17 }
 0x19a   : > { %v1142_v22 = vadd.f32 %v2335_v20, %v2333_v19 }
 0x19b   : > { %v1117_v23 = vpop.f32.mrf.mxu1 }
 0x19c   : > { %v1143_v24 = vrot.slane %v1142_v22, 4  ;;  %v1124_v29 = vadd.f32 %v1117_v23, %v1034_v26 }
 0x19e   : > { %v1144_v27 = vadd.f32 %v1143_v24, %v1142_v22  ;;  %v1132_v36 = vmul.f32 %v1800_v5, %v1124_v29 }
 0x1a0   : > { %v1145_v30 = vrot.slane %v1144_v27, 2  ;;  %v2339_v61 = vadd.f32 %v1801_v10, %v1132_v36 }
 0x1a2   : > { %v1146_v34 = vadd.f32 %v1145_v30, %v1144_v27 }
 0x1a3   : > { %v1119_v35 = vpop.f32.mrf.mxu1 }
 0x1a4   : > { %v1125_v37 = vadd.f32 %v1119_v35, %v1036_v33  ;;  %v1147_v38 = vrot.slane %v1146_v34, 1 }
 0x1a6   : > { %v1133_v54 = vmul.f32 %v1800_v5, %v1125_v37  ;;  %v1148_v40 = vadd.f32 %v1147_v38, %v1146_v34  ;;  %v1212_v5 = vunpack.c.l.bf16 %v381_v0 }
 0x1a8   : > { %v2341_v41 = vadd.f32 %v1801_v10, %v1133_v54  ;;  %v1156_v42 = vmul.f32 %v1155_v39, %v1148_v40 }
 0x1aa   : > { %v1225_v43 = vadd.f32 %v2341_v41, %v2339_v61  ;;  %1189 = vmatmul.f32.vlgmr.msrb.gmra.mxu2 %v1156_v42 }
 0x1ac   : > { %v1226_v44 = vrot.slane %v1225_v43, 4 }
 0x1ae   : > { %v1227_v45 = vadd.f32 %v1226_v44, %v1225_v43 }
 0x1b0   : > { %v1228_v46 = vrot.slane %v1227_v45, 2 }
 0x1b2   : > { %v1229_v63 = vadd.f32 %v1228_v46, %v1227_v45 }
 0x1b4   : > { %v1230_v47 = vrot.slane %v1229_v63, 1 }
 0x1b6   : > { %v1231_v14 = vadd.f32 %v1230_v47, %v1229_v63 }
 0x1b8   : > { %v1232_v48 = vmul.f32 %v1231_v14, %v1155_v39 }
 0x1ba   : > { %1265 = vmatmul.f32.vlgmr.msrb.gmra.mxu3 %v1232_v48 }
 0x22d   : > { %v1190_v12 = vpop.f32.mrf.mxu2 }
 0x22e   : > { %v1642_v16 = vmul.f32 -1.442695, %v1190_v12 }
 0x230   : > { %1804 = vpow2.f32 %v1642_v16 }
 0x236   : > { %v1805_v49 = vpop.eup %1804 }
 0x237   : > { %v1196_v50 = vadd.f32 1.0, %v1805_v49 }
 0x239   : > { %1806 = vrcp.f32 %v1196_v50  ;;  %v1208_v57 = vand.u32 2147483648, %v1196_v50  ;;  %v1206_v59 = vand.u32 2147483647, %v1196_v50  ;;  %vm1202_vm12 = vweird.f32 %v1196_v50 }
 0x23b   : > { %v1209_v1 = vor.u32 1.1754944e-38, %v1208_v57  ;;  %vm1207_vm14 = vcmp.eq.f32.partialorder %v1206_v59, 8.507059e+37 }
 0x23d   : > { %v1266_v51 = vpop.f32.mrf.mxu3 }
 0x23e   : > { %v1643_v52 = vmul.f32 -1.442695, %v1266_v51 }
 0x23f   : > { %v1807_v53 = vpop.eup %1806 }
 0x240   : > { %v1198_v55 = vmul.f32 %v1807_v53, %v1196_v50  ;;  %1808 = vpow2.f32 %v1643_v52  ;;  %vm1203_vm10 = vweird.f32 %v1807_v53 }
 0x241   : > { %vm1204_vm13 = vmor %vm1202_vm12, %vm1203_vm10 }
 0x242   : > { %v1199_v56 = vsub.f32 1.0, %v1198_v55 }
 0x244   : > { %v1200_v58 = vmul.f32 %v1807_v53, %v1199_v56 }
 0x246   : > { %v1809_v60 = vpop.eup %1808  ;;  %v1201_v62 = vadd.f32 %v1807_v53, %v1200_v58 }
 0x247   : > { %v1272_v2 = vadd.f32 1.0, %v1809_v60 }
 0x248   : > { %v1205_v3 = vsel %vm1204_vm13, %v1807_v53, %v1201_v62 }
 0x249   : > { %v1210_v4 = vsel %vm1207_vm14, %v1209_v1, %v1205_v3  ;;  %1810 = vrcp.f32 %v1272_v2  ;;  %v1284_v23 = vand.u32 2147483648, %v1272_v2  ;;  %v1282_v25 = vand.u32 2147483647, %v1272_v2 }
 0x24a   : > { %v1214_v7 = vperm.slane %v1210_v4, 0  ;;  %vm1278_vm0 = vweird.f32 %v1272_v2 }
 0x24b   : > { %v1285_v26 = vor.u32 1.1754944e-38, %v1284_v23  ;;  %vm1283_vm2 = vcmp.eq.f32.partialorder %v1282_v25, 8.507059e+37 }
 0x24c   : > { %v1215_v8 = vmul.f32 %v1214_v7, %v2333_v19  ;;  %v1216_v9 = vmul.f32 %v1214_v7, %v2335_v20  ;;  %v383_v20 = vld [vmem:[%s2189_s14 + $0x8] sm:$0xff]   ;;  %s1316_s14 = sshll.u32 %s1313_s11, 4  ;;  %s1317_s14 = int_to_ptr.hbm [resolvable:$true] %s1316_s14 }
 0x24d   : > { %v1288_v29 = vunpack.c.l.bf16 %v383_v20  ;;  %v1289_v30 = vunpack.c.h.bf16 %v383_v20  ;;  %s1946_s16 = sshra.s32 %s1317_s14, 4  ;;  %s1947_s16 = int_to_ptr.hbm [resolvable:$true] %s1946_s16 }
 0x24e   : > { %v1217_v10 = vadd.f32 %v1215_v8, %v1212_v5  ;;  %v1218_v11 = vadd.f32 %v1216_v9, %v1213_v6  ;;  %s1948_s23 = scalar_lea.hbm %s1947_s16, 16  ;;  %p1953_p11 = scmp.lt.s32.totalorder %s1947_s16, %s2394_s8 }
 0x24f   : > { %v1811_v13 = vpop.eup %1810  ;;  %p1949_p1 = scmp.ne.s32.totalorder %s1947_s16, %s1948_s23  ;;  %p1954_p9 = scmp.lt.s32.totalorder %s1952_s10, %s1948_s23 }
 0x250   : > { %v1274_v15 = vmul.f32 %v1811_v13, %v1272_v2  ;;  %v1219_v17 = vmax.f32 %v1217_v10, 0.0  ;;  %v1220_v18 = vmax.f32 %v1218_v11, 0.0  ;;  %vm1279_vm15 = vweird.f32 %v1811_v13 }
 0x251   : > { %vm1280_vm1 = vmor %vm1278_vm0, %vm1279_vm15  ;;  %p1950_p4 = pnand %p1949_p1, %p2153_p3  ;;  %p1955_p2 = por %p1954_p9, %p1953_p11 }
 0x252   : > { %v1275_v21 = vsub.f32 1.0, %v1274_v15  ;;  %v1704_v22 = vpack.c.bf16 %v1220_v18, %v1219_v17 }
 0x253   : > { %p1951_p8 = pneg %p1950_p4 }
 0x254   : > { %v1276_v24 = vmul.f32 %v1811_v13, %v1275_v21  ;;  %1705 = vst [vmem:[%s375_s18] sm:$0xff] %v1704_v22  }
 0x255   : > { %p1956_p10 = pnand %p1955_p2, %p1951_p8 }
 0x256   : > { %v1277_v19 = vadd.f32 %v1811_v13, %v1276_v24 }
 0x258   : > { %v1281_v27 = vsel %vm1280_vm1, %v1811_v13, %v1277_v19 }
 0x259   : > { %v1286_v28 = vsel %vm1283_vm2, %v1285_v26, %v1281_v27 }
 0x25a   : > { %v1290_v31 = vperm.slane %v1286_v28, 0 }
 0x25c   : > { %v1291_v32 = vmul.f32 %v1290_v31, %v2339_v61  ;;  %v1292_v33 = vmul.f32 %v1290_v31, %v2341_v41 }
 0x25e   : > { %v1293_v34 = vadd.f32 %v1291_v32, %v1288_v29  ;;  %v1294_v35 = vadd.f32 %v1292_v33, %v1289_v30 }
 0x260   : > { %v1295_v36 = vmax.f32 %v1293_v34, 0.0  ;;  %v1296_v37 = vmax.f32 %v1294_v35, 0.0 }
 0x262   : > { %v1709_v38 = vpack.c.bf16 %v1296_v37, %v1295_v36 }
 0x264   : > { %1711 = vst [vmem:[%s375_s18 + $0x8] sm:$0xff] %v1709_v38  }
 0x265   : > { %1959 = shalt.err (!%p1956_p10)
}
 0x266   : > { %s2018_s15 = smov 64   ;;  %s2019_s18 = smov 4  }
 0x267   : > { %1726 = dma.vmem_to_hbm [thread:$0]  (%p2153_p3), %s1315_s1, 256, %s1317_s14, %s1302_s9, %s2018_s15, %s2018_s15, %s2019_s18  }
 0x268 PF: > { %s1331_s26 = sand.u32 1, %s1994_s27   ;;  %p2427_p12 = scmp.ge.s32.totalorder %s2006_s30, 2 }
 0x269   : > { %s1332_s25 = scalar_lea.sflag [#allocation4], %s1331_s26 }
 0x26a   : > { %p1743_p13 = pnand %p2427_p12, %p2100_p6 }
 0x26c   : > { %p1744_p0 = pneg %p1743_p13 }
 0x26e   : > { %1989 = dma.done.wait (%p1744_p0), %s1332_s25, 256  }
 0x26f   : > { %1991 = vsyncadd (%p1744_p0), %s1332_s25, 4294967040  ;;  %p23_p5 = scmp.ge.s32.totalorder %s2140_s21, 4   ;;  %s2428_s27 = smov %s1998_s28 }
 0x270   : > { %s2429_s28 = smov %s2002_s29  ;;  %s2430_s29 = smov %s2149_s13 }
 0x271   : > { %s2431_s30 = smov %s2140_s21  ;;  %25 = sbr.rel (!%p23_p5) target bundleno = 10 (0xa), region = 113 }
 0x276   :  { %1338 = vsyncpa [#allocation3], 1 }
 0x277   :  { %1340 = vsyncpa [#allocation3 + $0x1], 1 }
 0x278   :  { %1341 = vsyncpa [#allocation6], 1 }
 0x279   :  { %1342 = vsyncpa [#allocation9], 1 }
 0x27a   :  { %1343 = vsyncpa [#allocation4], 1 }
 0x27b   :  { %1345 = vsyncpa [#allocation4 + $0x1], 1 }

</bundles_post_ra>
